<compile_context>
chip_gen: v7x
topology: tpu7x:2x2x1
jax: 0.10.0
libtpu: 0.0.40
codegen_flags: <defaults>
</compile_context>

<pallas_src>
import functools

import jax
import jax.numpy as jnp
from jax.experimental import pallas as pl
from jax.experimental.pallas import tpu as pltpu

_LANE = 128      # lane width: hidden-dim padding target (weights only, padded once)
_SUBLANE = 8     # sublane width: batch tiles must be multiples of this
_MAX_TILE_B = 512  # large tiles amortize ~0.35us/grid-step and hit HBM roofline


def _round_up(x, m):
    return ((x + m - 1) // m) * m


def _choose_tile_b(batch):
    """Pick a large batch tile, but keep >=2 grid steps when possible (v7x: 2 TCs)."""
    padded = _round_up(max(batch, 1), _SUBLANE)
    tile = min(_MAX_TILE_B, padded)
    if padded > tile:
        return tile                       # already >= 2 grid steps
    if padded >= 2 * _SUBLANE:
        return _round_up((padded + 1) // 2, _SUBLANE)   # split so both TCs get work
    return tile                           # tiny batch: single 8-row tile


def _make_mlp_kernel(num_linear):
    """Fused MLP kernel. Ref order: x, (w0, b0), (w1, b1), ..., out."""

    def kernel(*refs):
        x_ref = refs[0]
        o_ref = refs[-1]
        param_refs = refs[1:-1]
        h = x_ref[...]                      # (TILE_B, obs_dim) f32, unpadded lanes
        for i in range(num_linear):
            w = param_refs[2 * i][...]      # (in, out) f32, VMEM-resident
            b = param_refs[2 * i + 1][...]  # (1, out) f32
            # TODO(synk): if hidden widths grow past 128, cast operands to bf16
            # (fp8 on v7x) while keeping f32 accumulation; irrelevant at these sizes.
            h = jnp.dot(h, w, preferred_element_type=jnp.float32) + b
            if i < num_linear - 1:
                h = jnp.maximum(h, 0.0)     # ReLU on the VPU, f32
        o_ref[...] = h.astype(o_ref.dtype)  # narrow (TILE_B, n_actions) store

    return kernel


def init_rl_agent_params(key, obs_dim, layers, n_actions):
    """Deterministic parameter init mirroring the RLAgent layer shapes."""
    dims = [obs_dim] + list(layers) + [n_actions]
    params = []
    for i in range(len(dims) - 1):
        key, wk, bk = jax.random.split(key, 3)
        bound = 1.0 / jnp.sqrt(dims[i])     # torch.nn.Linear default scheme
        w = jax.random.uniform(wk, (dims[i], dims[i + 1]), jnp.float32,
                               minval=-bound, maxval=bound)
        b = jax.random.uniform(bk, (1, dims[i + 1]), jnp.float32,
                               minval=-bound, maxval=bound)
        params.append((w, b))
    return params


def pad_rl_agent_params(params):
    """Pad hidden dims to 128 lanes ONCE (exact zero padding); first input dim and
    final output dim stay at their real sizes so activations / logits stay narrow."""
    num = len(params)
    padded = []
    for i, (w, b) in enumerate(params):
        in_dim, out_dim = w.shape
        ip = in_dim if i == 0 else _round_up(in_dim, _LANE)
        op = out_dim if i == num - 1 else _round_up(out_dim, _LANE)
        wp = jnp.pad(w, ((0, ip - in_dim), (0, op - out_dim)))
        bp = jnp.pad(b, ((0, 0), (0, op - out_dim)))
        padded += [wp, bp]
    return padded


@functools.partial(jax.jit, static_argnames=("interpret",))
def rl_agent_forward(observation, padded_params, interpret=False):
    """Forward pass of RLAgent as a batch-gridded fused-MLP Pallas kernel.

    observation: (batch, obs_dim) float32 (any batch; batch padded internally)
    padded_params: flat list [W0, b0, W1, b1, ...] from pad_rl_agent_params
    returns: (batch, n_actions) float32 logits
    """
    num_linear = len(padded_params) // 2
    batch, obs_dim = observation.shape
    assert padded_params[0].shape[0] == obs_dim, "obs_dim / W0 mismatch"
    n_actions = padded_params[-2].shape[1]

    # --- batch tiling: large tiles, but >=2 grid steps when possible -------
    tile_b = _choose_tile_b(batch)
    padded_batch = _round_up(max(batch, 1), tile_b)
    x = observation.astype(jnp.float32)
    if padded_batch != batch:
        x = jnp.pad(x, ((0, padded_batch - batch), (0, 0)))

    grid = (padded_batch // tile_b,)

    # Activation tiles stream over the batch grid (full, unpadded last dim);
    # weights/biases are pinned to block (0, 0) so they stay VMEM-resident.
    x_spec = pl.BlockSpec((tile_b, obs_dim), lambda i: (i, 0))
    o_spec = pl.BlockSpec((tile_b, n_actions), lambda i: (i, 0))
    param_specs = [pl.BlockSpec(p.shape, lambda i: (0, 0)) for p in padded_params]

    kernel = _make_mlp_kernel(num_linear)

    out = pl.pallas_call(
        kernel,
        out_shape=jax.ShapeDtypeStruct((padded_batch, n_actions), jnp.float32),
        grid=grid,
        in_specs=[x_spec] + param_specs,
        out_specs=o_spec,
        compiler_params=pltpu.CompilerParams(
            # Batch axis is independent -> shard across v7x's 2 TensorCores.
            dimension_semantics=("parallel",),
            # Double-buffered (512,16)+(512,4) tiles + ~100 KB of params: tiny.
            vmem_limit_bytes=32 * 1024 * 1024,
        ),
        interpret=interpret,
    )(x, *padded_params)

    if padded_batch != batch:
        out = out[:batch]
    return out


def rl_agent_forward_ref(observation, params):
    """Pure-JAX reference of the same forward pass (unpadded params)."""
    h = observation
    for i, (w, b) in enumerate(params):
        h = h @ w + b
        if i < len(params) - 1:
            h = jnp.maximum(h, 0.0)
    return h


if __name__ == "__main__":
    # Module-consistent sizes: obs_dim=16 (1-D observation space),
    # layers=[32, 32], n_actions=4.
    obs_dim = 16
    layers = [32, 32]
    n_actions = 4

    key = jax.random.PRNGKey(0)
    key, big_key, small_key = jax.random.split(key, 3)
    params = init_rl_agent_params(key, obs_dim, layers, n_actions)
    padded_params = pad_rl_agent_params(params)   # padded ONCE, reused every call

    # 1) Batched rollout-style inference (the throughput case): batch=256 ->
    #    tile_b=128, 2 parallel grid steps (both v7x TCs busy).
    batch = 256
    obs_big = jax.random.normal(big_key, (batch, obs_dim), dtype=jnp.float32)
    logits = jax.block_until_ready(rl_agent_forward(obs_big, padded_params))
    ref = rl_agent_forward_ref(obs_big, params)
    assert logits.shape == (batch, n_actions)
    assert jnp.allclose(logits, ref, atol=1e-5, rtol=1e-5), "mismatch (batched)"

    # 2) Original tiny-batch online-action path (batch=2 -> single 8-row tile).
    obs_small = jax.random.normal(small_key, (2, obs_dim), dtype=jnp.float32)
    logits_small = jax.block_until_ready(rl_agent_forward(obs_small, padded_params))
    ref_small = rl_agent_forward_ref(obs_small, params)
    assert logits_small.shape == (2, n_actions)
    assert jnp.allclose(logits_small, ref_small, atol=1e-5, rtol=1e-5), \
        "mismatch (small batch)"

    # predict(): softmax + argmax epilogue in plain JAX. Use axis=-1 so it is
    # correct for batched logits (the module's dim=0 assumes a single 1-D vector).
    actions = jnp.argmax(jax.nn.softmax(logits_small, axis=-1), axis=-1)
    assert actions.shape == (2,)

    print("KERNEL_OK")
</pallas_src>

<mosaic_0001>
module attributes {stable_mosaic.version = 11 : i64} {
  func.func @kernel(%arg0: i32, %arg1: memref<128x16xf32, #tpu.memory_space<vmem>>, %arg2: memref<16x128xf32, #tpu.memory_space<vmem>>, %arg3: memref<1x128xf32, #tpu.memory_space<vmem>>, %arg4: memref<128x128xf32, #tpu.memory_space<vmem>>, %arg5: memref<1x128xf32, #tpu.memory_space<vmem>>, %arg6: memref<128x4xf32, #tpu.memory_space<vmem>>, %arg7: memref<1x4xf32, #tpu.memory_space<vmem>>, %arg8: memref<128x4xf32, #tpu.memory_space<vmem>>) attributes {dimension_semantics = [#tpu.dimension_semantics<parallel>], iteration_bounds = array<i64: 2>, scalar_prefetch = 0 : i64, scratch_operands = 0 : i64, tpu.core_type = #tpu.core_type<tc>, window_params = [{transform_indices = @transform_0, window_bounds = array<i64: 128, 16>}, {pipeline_mode = #tpu.pipeline_mode<synchronous>, transform_indices = @transform_1, window_bounds = array<i64: 16, 128>}, {pipeline_mode = #tpu.pipeline_mode<synchronous>, transform_indices = @transform_2, window_bounds = array<i64: 1, 128>}, {pipeline_mode = #tpu.pipeline_mode<synchronous>, transform_indices = @transform_3, window_bounds = array<i64: 128, 128>}, {pipeline_mode = #tpu.pipeline_mode<synchronous>, transform_indices = @transform_4, window_bounds = array<i64: 1, 128>}, {pipeline_mode = #tpu.pipeline_mode<synchronous>, transform_indices = @transform_5, window_bounds = array<i64: 128, 4>}, {pipeline_mode = #tpu.pipeline_mode<synchronous>, transform_indices = @transform_6, window_bounds = array<i64: 1, 4>}, {transform_indices = @transform_7, window_bounds = array<i64: 128, 4>}]} {
    %c0 = arith.constant 0 : index
    %c0_0 = arith.constant 0 : index
    %0 = vector.load %arg1[%c0, %c0_0] : memref<128x16xf32, #tpu.memory_space<vmem>>, vector<128x16xf32>
    %c0_1 = arith.constant 0 : index
    %c0_2 = arith.constant 0 : index
    %1 = vector.load %arg2[%c0_1, %c0_2] : memref<16x128xf32, #tpu.memory_space<vmem>>, vector<16x128xf32>
    %c0_3 = arith.constant 0 : index
    %c0_4 = arith.constant 0 : index
    %2 = vector.load %arg3[%c0_3, %c0_4] : memref<1x128xf32, #tpu.memory_space<vmem>>, vector<1x128xf32>
    %cst = arith.constant dense<0.000000e+00> : vector<128x128xf32>
    %3 = tpu.matmul %0, %1, %cst {dimension_numbers = #tpu.dot_dimension_numbers<[1], [0], [0], [1], [0, 0, 1, 1], [], []>} : vector<128x16xf32>, vector<16x128xf32>, vector<128x128xf32> -> vector<128x128xf32>
    %4 = vector.broadcast %2 : vector<1x128xf32> to vector<128x128xf32>
    %5 = arith.addf %3, %4 : vector<128x128xf32>
    %cst_5 = arith.constant 0.000000e+00 : f32
    %6 = vector.broadcast %cst_5 : f32 to vector<128x128xf32>
    %7 = arith.maximumf %5, %6 : vector<128x128xf32>
    %c0_6 = arith.constant 0 : index
    %c0_7 = arith.constant 0 : index
    %8 = vector.load %arg4[%c0_6, %c0_7] : memref<128x128xf32, #tpu.memory_space<vmem>>, vector<128x128xf32>
    %c0_8 = arith.constant 0 : index
    %c0_9 = arith.constant 0 : index
    %9 = vector.load %arg5[%c0_8, %c0_9] : memref<1x128xf32, #tpu.memory_space<vmem>>, vector<1x128xf32>
    %cst_10 = arith.constant dense<0.000000e+00> : vector<128x128xf32>
    %10 = tpu.matmul %7, %8, %cst_10 {dimension_numbers = #tpu.dot_dimension_numbers<[1], [0], [0], [1], [0, 0, 1, 1], [], []>} : vector<128x128xf32>, vector<128x128xf32>, vector<128x128xf32> -> vector<128x128xf32>
    %11 = vector.broadcast %9 : vector<1x128xf32> to vector<128x128xf32>
    %12 = arith.addf %10, %11 : vector<128x128xf32>
    %cst_11 = arith.constant 0.000000e+00 : f32
    %13 = vector.broadcast %cst_11 : f32 to vector<128x128xf32>
    %14 = arith.maximumf %12, %13 : vector<128x128xf32>
    %c0_12 = arith.constant 0 : index
    %c0_13 = arith.constant 0 : index
    %15 = vector.load %arg6[%c0_12, %c0_13] : memref<128x4xf32, #tpu.memory_space<vmem>>, vector<128x4xf32>
    %c0_14 = arith.constant 0 : index
    %c0_15 = arith.constant 0 : index
    %16 = vector.load %arg7[%c0_14, %c0_15] : memref<1x4xf32, #tpu.memory_space<vmem>>, vector<1x4xf32>
    %cst_16 = arith.constant dense<0.000000e+00> : vector<128x4xf32>
    %17 = tpu.matmul %14, %15, %cst_16 {dimension_numbers = #tpu.dot_dimension_numbers<[1], [0], [0], [1], [0, 0, 1, 1], [], []>} : vector<128x128xf32>, vector<128x4xf32>, vector<128x4xf32> -> vector<128x4xf32>
    %18 = vector.broadcast %16 : vector<1x4xf32> to vector<128x4xf32>
    %19 = arith.addf %17, %18 : vector<128x4xf32>
    %c0_17 = arith.constant 0 : index
    %c0_18 = arith.constant 0 : index
    %20 = vector.load %arg8[%c0_17, %c0_18] : memref<128x4xf32, #tpu.memory_space<vmem>>, vector<128x4xf32>
    tpu.vector_store %arg8[%c0_17, %c0_18], %19 {strides = array<i32>} : memref<128x4xf32, #tpu.memory_space<vmem>>, vector<128x4xf32>,
    return
  }
  func.func @transform_0(%arg0: i32) -> (i32, i32) {
    %c0_i32 = arith.constant 0 : i32
    %c0_i32_0 = arith.constant 0 : i32
    return %arg0, %c0_i32 : i32, i32
  }
  func.func @transform_1(%arg0: i32) -> (i32, i32) {
    %c0_i32 = arith.constant 0 : i32
    %c0_i32_0 = arith.constant 0 : i32
    %c0_i32_1 = arith.constant 0 : i32
    return %c0_i32, %c0_i32_0 : i32, i32
  }
  func.func @transform_2(%arg0: i32) -> (i32, i32) {
    %c0_i32 = arith.constant 0 : i32
    %c0_i32_0 = arith.constant 0 : i32
    %c0_i32_1 = arith.constant 0 : i32
    return %c0_i32, %c0_i32_0 : i32, i32
  }
  func.func @transform_3(%arg0: i32) -> (i32, i32) {
    %c0_i32 = arith.constant 0 : i32
    %c0_i32_0 = arith.constant 0 : i32
    %c0_i32_1 = arith.constant 0 : i32
    return %c0_i32, %c0_i32_0 : i32, i32
  }
  func.func @transform_4(%arg0: i32) -> (i32, i32) {
    %c0_i32 = arith.constant 0 : i32
    %c0_i32_0 = arith.constant 0 : i32
    %c0_i32_1 = arith.constant 0 : i32
    return %c0_i32, %c0_i32_0 : i32, i32
  }
  func.func @transform_5(%arg0: i32) -> (i32, i32) {
    %c0_i32 = arith.constant 0 : i32
    %c0_i32_0 = arith.constant 0 : i32
    %c0_i32_1 = arith.constant 0 : i32
    return %c0_i32, %c0_i32_0 : i32, i32
  }
  func.func @transform_6(%arg0: i32) -> (i32, i32) {
    %c0_i32 = arith.constant 0 : i32
    %c0_i32_0 = arith.constant 0 : i32
    %c0_i32_1 = arith.constant 0 : i32
    return %c0_i32, %c0_i32_0 : i32, i32
  }
  func.func @transform_7(%arg0: i32) -> (i32, i32) {
    %c0_i32 = arith.constant 0 : i32
    %c0_i32_0 = arith.constant 0 : i32
    return %arg0, %c0_i32 : i32, i32
  }
}

</mosaic_0001>

<bundles_post_ra>
// kernel: rl_agent_forward.1
= control target key start
LH: loop header
LB: loop body
LE: loop exit
PB: predicated region body
PF: predicated region fallthrough
CT: control target
= control target key end

     0   :  { %s1318_s24 = smov 0   ;;  %s1521_s0 = inlined_call_operand.vmem [shape: f32[256,16], index: 0, kind: input, shape index: {}]   ;;  %s1522_s1 = inlined_call_operand.vmem [shape: f32[16,128], index: 1, kind: input, shape index: {}]   ;;  %s1523_s2 = inlined_call_operand.vmem [shape: f32[1,128], index: 2, kind: input, shape index: {}]   ;;  %s1524_s3 = inlined_call_operand.vmem [shape: f32[128,128], index: 3, kind: input, shape index: {}]   ;;  %s1525_s4 = inlined_call_operand.vmem [shape: f32[1,128], index: 4, kind: input, shape index: {}]   ;;  %s1526_s5 = inlined_call_operand.vmem [shape: f32[128,4], index: 5, kind: input, shape index: {}]   ;;  %s1527_s6 = inlined_call_operand.vmem [shape: f32[1,4], index: 6, kind: input, shape index: {}]   ;;  %s1528_s7 = inlined_call_operand.vmem [shape: f32[256,4], index: 7, kind: output, shape index: {}]  }
   0x1 LB: > { %s942_s25 = sadd.s32 4294967295, %s1276_s24   ;;  %p946_p0 = scmp.ge.s32.totalorder %s1276_s24, 1  ;;  %s1276_s24 = sphi %s1318_s24, %s17_s24  }
   0x2   : > { %p238_p1 = scmp.lt.s32.totalorder %s1276_s24, 3 }
   0x4   : > { %p239_p2 = pnand %p946_p0, %p238_p1 }
   0x5   : > { %v298_v0 = vld [vmem:[%s1522_s1] sm:$0xff] (!%p239_p2)  ;;  %v299_v1 = vld [vmem:[%s1522_s1 + $0x8] sm:$0xff] (!%p239_p2)  ;;  %s947_s30 = sshll.u32 (!%p239_p2), %s942_s25, 4  ;;  %v519_v5 = vld [vmem:[%s1524_s3 + $0x10] sm:$0xff] (!%p239_p2)  ;;  %vm307_vm0 = vcmask (!%p239_p2), 130048   ;;  %vm869_vm1 = vcmask (!%p239_p2), 31744  }
   0x6   : > { %242 = sbr.rel (%p239_p2) target bundleno = 698 (0x2ba), region = 48  ;;  %v517_v2 = vld [vmem:[%s1524_s3] sm:$0xff] (!%p239_p2)  ;;  %v1194_v3 = vpack.c.bf16 (!%p239_p2), %v299_v1, %v298_v0  ;;  %p271_p3 = scmp.lt.s32.totalorder (!%p239_p2), %s947_s30, 31  ;;  %v518_v4 = vld [vmem:[%s1524_s3 + $0x8] sm:$0xff] (!%p239_p2)  ;;  %v520_v6 = vld [vmem:[%s1524_s3 + $0x18] sm:$0xff] (!%p239_p2) }
   0x7   : > { %v1198_v7 = vpack.c.bf16 (!%p239_p2), %v518_v4, %v517_v2  ;;  %v1202_v8 = vpack.c.bf16 (!%p239_p2), %v520_v6, %v519_v5  ;;  %v521_v9 = vld [vmem:[%s1524_s3 + $0x20] sm:$0xff] (!%p239_p2)  ;;  %v522_v10 = vld [vmem:[%s1524_s3 + $0x28] sm:$0xff] (!%p239_p2)  ;;  %v523_v12 = vld [vmem:[%s1524_s3 + $0x30] sm:$0xff] (!%p239_p2) }
   0x8   : > { %1195 = vmatprep.subr.bf16.mxu0 (!%p239_p2), %v1194_v3  ;;  %v1206_v11 = vpack.c.bf16 (!%p239_p2), %v522_v10, %v521_v9  ;;  %v524_v13 = vld [vmem:[%s1524_s3 + $0x38] sm:$0xff] (!%p239_p2)  ;;  %v525_v20 = vld [vmem:[%s1524_s3 + $0x40] sm:$0xff] (!%p239_p2)  ;;  %v526_v21 = vld [vmem:[%s1524_s3 + $0x48] sm:$0xff] (!%p239_p2) }
   0x9   : > { %1197 = vmatpush3.bf16.msra.mxu0 (!%p239_p2), %v1194_v3  ;;  %1199 = vmatprep.subr.bf16.mxu1 (!%p239_p2), %v1198_v7  ;;  %v1210_v18 = vpack.c.bf16 (!%p239_p2), %v524_v13, %v523_v12  ;;  %v1214_v23 = vpack.c.bf16 (!%p239_p2), %v526_v21, %v525_v20  ;;  %v527_v25 = vld [vmem:[%s1524_s3 + $0x50] sm:$0xff] (!%p239_p2)  ;;  %v528_v26 = vld [vmem:[%s1524_s3 + $0x58] sm:$0xff] (!%p239_p2)  ;;  %v529_v30 = vld [vmem:[%s1524_s3 + $0x60] sm:$0xff] (!%p239_p2) }
   0xa   : > { %1201 = vmatpush3.bf16.msra.mxu1 (!%p239_p2), %v1198_v7  ;;  %v1218_v28 = vpack.c.bf16 (!%p239_p2), %v528_v26, %v527_v25  ;;  %v530_v31 = vld [vmem:[%s1524_s3 + $0x68] sm:$0xff] (!%p239_p2)  ;;  %v531_v40 = vld [vmem:[%s1524_s3 + $0x70] sm:$0xff] (!%p239_p2)  ;;  %v532_v41 = vld [vmem:[%s1524_s3 + $0x78] sm:$0xff] (!%p239_p2) }
   0xb   : > { %1203 = vmatprep.subr.bf16.mxu1 (!%p239_p2), %v1202_v8  ;;  %v1222_v33 = vpack.c.bf16 (!%p239_p2), %v530_v31, %v529_v30  ;;  %v1226_v42 = vpack.c.bf16 (!%p239_p2), %v532_v41, %v531_v40  ;;  %v701_v43 = vld [vmem:[%s1526_s5] sm:$0xff] (!%p239_p2)  ;;  %v702_v44 = vld [vmem:[%s1526_s5 + $0x8] sm:$0xff] (!%p239_p2)  ;;  %v703_v45 = vld [vmem:[%s1526_s5 + $0x10] sm:$0xff] (!%p239_p2) }
   0xc   : > { %v1230_v46 = vpack.c.bf16 (!%p239_p2), %v702_v44, %v701_v43  ;;  %v704_v47 = vld [vmem:[%s1526_s5 + $0x18] sm:$0xff] (!%p239_p2)  ;;  %v705_v49 = vld [vmem:[%s1526_s5 + $0x20] sm:$0xff] (!%p239_p2)  ;;  %v706_v50 = vld [vmem:[%s1526_s5 + $0x28] sm:$0xff] (!%p239_p2) }
   0xd   : > { %s1530_s30 = smov (!%p271_p3, %s947_s30), 31  ;;  %v1234_v48 = vpack.c.bf16 %v704_v47, %v703_v45  ;;  %v1238_v51 = vpack.c.bf16 %v706_v50, %v705_v49  ;;  %v707_v52 = vld [vmem:[%s1526_s5 + $0x30] sm:$0xff]  ;;  %v708_v53 = vld [vmem:[%s1526_s5 + $0x38] sm:$0xff]  ;;  %v709_v55 = vld [vmem:[%s1526_s5 + $0x40] sm:$0xff] }
   0xe   : > { %s948_s20 = sshll.u32 %s1530_s30, 3  ;;  %1205 = vmatpush3.bf16.msra.mxu1 %v1202_v8  ;;  %1231 = vmatprep.subr.bf16.mxu0 %v1230_v46  ;;  %v1242_v54 = vpack.c.bf16 %v708_v53, %v707_v52  ;;  %v710_v56 = vld [vmem:[%s1526_s5 + $0x48] sm:$0xff]  ;;  %v711_v58 = vld [vmem:[%s1526_s5 + $0x50] sm:$0xff]  ;;  %v712_v59 = vld [vmem:[%s1526_s5 + $0x58] sm:$0xff] }
   0xf   : > { %s1358_s23 = scalar_lea.vmem %s1521_s0, %s948_s20  ;;  %1207 = vmatprep.subr.bf16.mxu1 %v1206_v11  ;;  %v1246_v57 = vpack.c.bf16 %v710_v56, %v709_v55  ;;  %v1250_v60 = vpack.c.bf16 %v712_v59, %v711_v58  ;;  %v713_v61 = vld [vmem:[%s1526_s5 + $0x60] sm:$0xff]  ;;  %v714_v62 = vld [vmem:[%s1526_s5 + $0x68] sm:$0xff]  ;;  %v715_v49 = vld [vmem:[%s1526_s5 + $0x70] sm:$0xff]  ;;  %s1484_s26 = scalar_lea.vmem %s1528_s7, %s948_s20 }
  0x10   : > { %v282_v14 = vld [vmem:[%s1358_s23] sm:$0xff]  ;;  %v283_v15 = vld [vmem:[%s1358_s23 + $0x8] sm:$0xff]  ;;  %v284_v16 = vld [vmem:[%s1358_s23 + $0x10] sm:$0xff]  ;;  %v1254_v63 = vpack.c.bf16 %v714_v62, %v713_v61 }
  0x11   : > { %1058 = vmatprep.mubr.msk.f32.mxu0 %vm307_vm0, %v282_v14  ;;  %v285_v17 = vld [vmem:[%s1358_s23 + $0x18] sm:$0xff]  ;;  %v286_v19 = vld [vmem:[%s1358_s23 + $0x20] sm:$0xff]  ;;  %v287_v22 = vld [vmem:[%s1358_s23 + $0x28] sm:$0xff] }
  0x12   : > { %1059 = vmatmul.mubr.msk.f32.vlgmr.msra.gmra.mrb[0].mxu0 %vm307_vm0, %v283_v15  ;;  %1209 = vmatpush3.bf16.msra.mxu1 %v1206_v11  ;;  %v288_v24 = vld [vmem:[%s1358_s23 + $0x30] sm:$0xff]  ;;  %v289_v27 = vld [vmem:[%s1358_s23 + $0x38] sm:$0xff]  ;;  %v290_v29 = vld [vmem:[%s1358_s23 + $0x40] sm:$0xff] }
  0x13   : > { %1061 = vmatprep.mubr.msk.f32.mxu0 %vm307_vm0, %v284_v16  ;;  %1211 = vmatprep.subr.bf16.mxu1 %v1210_v18  ;;  %v291_v32 = vld [vmem:[%s1358_s23 + $0x48] sm:$0xff]  ;;  %v292_v34 = vld [vmem:[%s1358_s23 + $0x50] sm:$0xff]  ;;  %v293_v35 = vld [vmem:[%s1358_s23 + $0x58] sm:$0xff] }
  0x14   : > { %v294_v36 = vld [vmem:[%s1358_s23 + $0x60] sm:$0xff]  ;;  %v295_v37 = vld [vmem:[%s1358_s23 + $0x68] sm:$0xff]  ;;  %v296_v38 = vld [vmem:[%s1358_s23 + $0x70] sm:$0xff]  ;;  %1233 = vmatpush3.bf16.msra.mxu0 %v1230_v46 }
  0x15   : > { %v297_v39 = vld [vmem:[%s1358_s23 + $0x78] sm:$0xff]  ;;  %1235 = vmatprep.subr.bf16.mxu0 %v1234_v48  ;;  %v951_v0 = vld [vmem:[%s1523_s2] ss:$0 sm:$0xff] }
  0x16   : > { %1062 = vmatmul.mubr.msk.f32.gmra.mrb[2].mxu0 %vm307_vm0, %v285_v17  ;;  %1213 = vmatpush3.bf16.msra.mxu1 %v1210_v18  ;;  %v716_v50 = vld [vmem:[%s1526_s5 + $0x78] sm:$0xff]  ;;  %v968_v52 = vld [vmem:[%s1525_s4] ss:$0 sm:$0xff] }
  0x17   : > { %1064 = vmatprep.mubr.msk.f32.mxu0 %vm307_vm0, %v286_v19  ;;  %1215 = vmatprep.subr.bf16.mxu1 %v1214_v23 }
  0x18   : > { %1237 = vmatpush3.bf16.msra.mxu0 %v1234_v48 }
  0x19   : > { %1239 = vmatprep.subr.bf16.mxu0 %v1238_v51 }
  0x1a   : > { %1065 = vmatmul.mubr.msk.f32.gmra.mrb[4].mxu0 %vm307_vm0, %v287_v22  ;;  %1217 = vmatpush3.bf16.msra.mxu1 %v1214_v23 }
  0x1b   : > { %1067 = vmatprep.mubr.msk.f32.mxu0 %vm307_vm0, %v288_v24  ;;  %1219 = vmatprep.subr.bf16.mxu1 %v1218_v28 }
  0x1c   : > { %1241 = vmatpush3.bf16.msra.mxu0 %v1238_v51  ;;  %v1258_v51 = vpack.c.bf16 %v716_v50, %v715_v49 }
  0x1d   : > { %1243 = vmatprep.subr.bf16.mxu0 %v1242_v54 }
  0x1e   : > { %1068 = vmatmul.mubr.msk.f32.gmra.mrb[6].mxu0 %vm307_vm0, %v289_v27  ;;  %1221 = vmatpush3.bf16.msra.mxu1 %v1218_v28 }
  0x1f   : > { %1070 = vmatprep.mubr.msk.f32.mxu0 %vm307_vm0, %v290_v29  ;;  %1223 = vmatprep.subr.bf16.mxu1 %v1222_v33 }
  0x20   : > { %1245 = vmatpush3.bf16.msra.mxu0 %v1242_v54 }
  0x21   : > { %1247 = vmatprep.subr.bf16.mxu0 %v1246_v57 }
  0x22   : > { %1071 = vmatmul.mubr.msk.f32.gmra.mrb[8].mxu0 %vm307_vm0, %v291_v32  ;;  %1225 = vmatpush3.bf16.msra.mxu1 %v1222_v33 }
  0x23   : > { %1073 = vmatprep.mubr.msk.f32.mxu0 %vm307_vm0, %v292_v34  ;;  %1227 = vmatprep.subr.bf16.mxu1 %v1226_v42 }
  0x24   : > { %1249 = vmatpush3.bf16.msra.mxu0 %v1246_v57 }
  0x25   : > { %1251 = vmatprep.subr.bf16.mxu0 %v1250_v60 }
  0x26   : > { %1074 = vmatmul.mubr.msk.f32.gmra.mrb[10].mxu0 %vm307_vm0, %v293_v35  ;;  %1229 = vmatpush3.bf16.msra.mxu1 %v1226_v42 }
  0x27   : > { %1076 = vmatprep.mubr.msk.f32.mxu0 %vm307_vm0, %v294_v36 }
  0x28   : > { %1253 = vmatpush3.bf16.msra.mxu0 %v1250_v60 }
  0x29   : > { %1255 = vmatprep.subr.bf16.mxu0 %v1254_v63 }
  0x2a   : > { %1077 = vmatmul.mubr.msk.f32.gmra.mrb[12].mxu0 %vm307_vm0, %v295_v37 }
  0x2b   : > { %1079 = vmatprep.mubr.msk.f32.mxu0 %vm307_vm0, %v296_v38 }
  0x2c   : > { %1257 = vmatpush3.bf16.msra.mxu0 %v1254_v63 }
  0x2d   : > { %1259 = vmatprep.subr.bf16.mxu0 %v1258_v51 }
  0x2e   : > { %1080 = vmatmul.mubr.msk.f32.gmra.mrb[14].mxu0 %vm307_vm0, %v297_v39 }
  0x30   : > { %1261 = vmatpush3.bf16.msra.mxu0 %v1258_v51 }
  0xe5   : > { %v1060_v1 = vpop.f32.mrb[0].mxu0 }
  0xe6   : > { %v428_v2 = vadd.f32 %v1060_v1, %v951_v0  ;;  %v422_v3 = vpop.f32.mrb[1].mxu0 }
  0xe7   : > { %v423_v4 = vadd.f32 %v951_v0, %v422_v3 }
  0xe8   : > { %v502_v7 = vmax.f32 %v428_v2, 0.0 }
  0xe9   : > { %v1063_v5 = vpop.f32.mrb[2].mxu0  ;;  %v501_v6 = vmax.f32 %v423_v4, 0.0 }
  0xea   : > { %v438_v8 = vadd.f32 %v1063_v5, %v951_v0  ;;  %v432_v9 = vpop.f32.mrb[3].mxu0 }
  0xeb   : > { %v433_v10 = vadd.f32 %v951_v0, %v432_v9  ;;  %1114 = vmatprep.mubr.f32.mxu1 %v501_v6 }
  0xec   : > { %1115 = vmatmul.mubr.f32.vlgmr.msra.gmra.mrb[0].mxu1 %v502_v7  ;;  %v504_v13 = vmax.f32 %v438_v8, 0.0 }
  0xed   : > { %v503_v11 = vmax.f32 %v433_v10, 0.0  ;;  %v1066_v12 = vpop.f32.mrb[4].mxu0 }
  0xee   : > { %v448_v14 = vadd.f32 %v1066_v12, %v951_v0  ;;  %v442_v15 = vpop.f32.mrb[5].mxu0 }
  0xef   : > { %v443_v16 = vadd.f32 %v951_v0, %v442_v15  ;;  %1117 = vmatprep.mubr.f32.mxu1 %v503_v11 }
  0xf0   : > { %1118 = vmatmul.mubr.f32.gmra.mrb[2].mxu1 %v504_v13  ;;  %v506_v19 = vmax.f32 %v448_v14, 0.0 }
  0xf1   : > { %v505_v17 = vmax.f32 %v443_v16, 0.0  ;;  %v1069_v18 = vpop.f32.mrb[6].mxu0 }
  0xf2   : > { %v458_v20 = vadd.f32 %v1069_v18, %v951_v0  ;;  %v452_v21 = vpop.f32.mrb[7].mxu0 }
  0xf3   : > { %v453_v22 = vadd.f32 %v951_v0, %v452_v21  ;;  %1120 = vmatprep.mubr.f32.mxu1 %v505_v17 }
  0xf4   : > { %1121 = vmatmul.mubr.f32.gmra.mrb[4].mxu1 %v506_v19  ;;  %v508_v25 = vmax.f32 %v458_v20, 0.0 }
  0xf5   : > { %v507_v23 = vmax.f32 %v453_v22, 0.0  ;;  %v1072_v24 = vpop.f32.mrb[8].mxu0 }
  0xf6   : > { %v468_v26 = vadd.f32 %v1072_v24, %v951_v0  ;;  %v462_v27 = vpop.f32.mrb[9].mxu0 }
  0xf7   : > { %v463_v28 = vadd.f32 %v951_v0, %v462_v27  ;;  %1123 = vmatprep.mubr.f32.mxu1 %v507_v23 }
  0xf8   : > { %1124 = vmatmul.mubr.f32.gmra.mrb[6].mxu1 %v508_v25  ;;  %v510_v31 = vmax.f32 %v468_v26, 0.0 }
  0xf9   : > { %v509_v29 = vmax.f32 %v463_v28, 0.0  ;;  %v1075_v30 = vpop.f32.mrb[10].mxu0 }
  0xfa   : > { %v478_v32 = vadd.f32 %v1075_v30, %v951_v0  ;;  %v472_v33 = vpop.f32.mrb[11].mxu0 }
  0xfb   : > { %v473_v34 = vadd.f32 %v951_v0, %v472_v33  ;;  %1126 = vmatprep.mubr.f32.mxu1 %v509_v29 }
  0xfc   : > { %1127 = vmatmul.mubr.f32.gmra.mrb[8].mxu1 %v510_v31  ;;  %v512_v37 = vmax.f32 %v478_v32, 0.0 }
  0xfd   : > { %v511_v35 = vmax.f32 %v473_v34, 0.0  ;;  %v1078_v36 = vpop.f32.mrb[12].mxu0 }
  0xfe   : > { %v488_v38 = vadd.f32 %v1078_v36, %v951_v0  ;;  %v482_v39 = vpop.f32.mrb[13].mxu0 }
  0xff   : > { %v483_v40 = vadd.f32 %v951_v0, %v482_v39  ;;  %1129 = vmatprep.mubr.f32.mxu1 %v511_v35 }
 0x100   : > { %1130 = vmatmul.mubr.f32.gmra.mrb[10].mxu1 %v512_v37  ;;  %v514_v43 = vmax.f32 %v488_v38, 0.0  ;;  %v969_v37 = vld [vmem:[%s1527_s6] ss:$0 sm:$0xff] }
 0x101   : > { %v513_v41 = vmax.f32 %v483_v40, 0.0  ;;  %v1081_v42 = vpop.f32.mrb[14].mxu0 }
 0x102   : > { %v498_v44 = vadd.f32 %v1081_v42, %v951_v0  ;;  %v492_v45 = vpop.f32.mrb[15].mxu0 }
 0x103   : > { %v493_v46 = vadd.f32 %v951_v0, %v492_v45  ;;  %1132 = vmatprep.mubr.f32.mxu1 %v513_v41 }
 0x104   : > { %1133 = vmatmul.mubr.f32.gmra.mrb[12].mxu1 %v514_v43  ;;  %v516_v48 = vmax.f32 %v498_v44, 0.0 }
 0x105   : > { %v515_v47 = vmax.f32 %v493_v46, 0.0 }
 0x107   : > { %1135 = vmatprep.mubr.f32.mxu1 %v515_v47 }
 0x108   : > { %1136 = vmatmul.mubr.f32.gmra.mrb[14].mxu1 %v516_v48 }
 0x1bf   : > { %v1116_v53 = vpop.f32.mrb[0].mxu1 }
 0x1c0   : > { %v612_v54 = vadd.f32 %v1116_v53, %v968_v52  ;;  %v606_v55 = vpop.f32.mrb[1].mxu1 }
 0x1c1   : > { %v607_v56 = vadd.f32 %v968_v52, %v606_v55 }
 0x1c2   : > { %v686_v59 = vmax.f32 %v612_v54, 0.0 }
 0x1c3   : > { %v685_v57 = vmax.f32 %v607_v56, 0.0  ;;  %v1119_v58 = vpop.f32.mrb[2].mxu1 }
 0x1c4   : > { %v622_v60 = vadd.f32 %v1119_v58, %v968_v52  ;;  %v616_v61 = vpop.f32.mrb[3].mxu1 }
 0x1c5   : > { %v617_v62 = vadd.f32 %v968_v52, %v616_v61  ;;  %1170 = vmatprep.mubr.f32.mxu0 %v685_v57 }
 0x1c6   : > { %1171 = vmatmul.mubr.f32.vlgmr.msra.gmra.mrb[16].mxu0 %v686_v59  ;;  %v688_v1 = vmax.f32 %v622_v60, 0.0 }
 0x1c7   : > { %v687_v63 = vmax.f32 %v617_v62, 0.0  ;;  %v1122_v0 = vpop.f32.mrb[4].mxu1 }
 0x1c8   : > { %v632_v2 = vadd.f32 %v1122_v0, %v968_v52  ;;  %v626_v3 = vpop.f32.mrb[5].mxu1 }
 0x1c9   : > { %v627_v4 = vadd.f32 %v968_v52, %v626_v3  ;;  %1173 = vmatprep.mubr.f32.mxu0 %v687_v63 }
 0x1ca   : > { %1174 = vmatmul.mubr.f32.gmra.mrb[18].mxu0 %v688_v1  ;;  %v690_v7 = vmax.f32 %v632_v2, 0.0 }
 0x1cb   : > { %v689_v5 = vmax.f32 %v627_v4, 0.0  ;;  %v1125_v6 = vpop.f32.mrb[6].mxu1 }
 0x1cc   : > { %v642_v8 = vadd.f32 %v1125_v6, %v968_v52  ;;  %v636_v9 = vpop.f32.mrb[7].mxu1 }
 0x1cd   : > { %v637_v10 = vadd.f32 %v968_v52, %v636_v9  ;;  %1176 = vmatprep.mubr.f32.mxu0 %v689_v5 }
 0x1ce   : > { %1177 = vmatmul.mubr.f32.gmra.mrb[20].mxu0 %v690_v7  ;;  %v692_v13 = vmax.f32 %v642_v8, 0.0 }
 0x1cf   : > { %v691_v11 = vmax.f32 %v637_v10, 0.0  ;;  %v1128_v12 = vpop.f32.mrb[8].mxu1 }
 0x1d0   : > { %v652_v14 = vadd.f32 %v1128_v12, %v968_v52  ;;  %v646_v15 = vpop.f32.mrb[9].mxu1 }
 0x1d1   : > { %v647_v16 = vadd.f32 %v968_v52, %v646_v15  ;;  %1179 = vmatprep.mubr.f32.mxu0 %v691_v11 }
 0x1d2   : > { %1180 = vmatmul.mubr.f32.gmra.mrb[22].mxu0 %v692_v13  ;;  %v694_v19 = vmax.f32 %v652_v14, 0.0 }
 0x1d3   : > { %v693_v17 = vmax.f32 %v647_v16, 0.0  ;;  %v1131_v18 = vpop.f32.mrb[10].mxu1 }
 0x1d4   : > { %v662_v20 = vadd.f32 %v1131_v18, %v968_v52  ;;  %v656_v21 = vpop.f32.mrb[11].mxu1 }
 0x1d5   : > { %v657_v22 = vadd.f32 %v968_v52, %v656_v21  ;;  %1182 = vmatprep.mubr.f32.mxu0 %v693_v17 }
 0x1d6   : > { %1183 = vmatmul.mubr.f32.gmra.mrb[24].mxu0 %v694_v19  ;;  %v696_v25 = vmax.f32 %v662_v20, 0.0 }
 0x1d7   : > { %v695_v23 = vmax.f32 %v657_v22, 0.0  ;;  %v1134_v24 = vpop.f32.mrb[12].mxu1 }
 0x1d8   : > { %v672_v26 = vadd.f32 %v1134_v24, %v968_v52  ;;  %v666_v27 = vpop.f32.mrb[13].mxu1 }
 0x1d9   : > { %v667_v28 = vadd.f32 %v968_v52, %v666_v27  ;;  %1185 = vmatprep.mubr.f32.mxu0 %v695_v23 }
 0x1da   : > { %1186 = vmatmul.mubr.f32.gmra.mrb[26].mxu0 %v696_v25  ;;  %v698_v31 = vmax.f32 %v672_v26, 0.0 }
 0x1db   : > { %v697_v29 = vmax.f32 %v667_v28, 0.0  ;;  %v1137_v30 = vpop.f32.mrb[14].mxu1 }
 0x1dc   : > { %v682_v32 = vadd.f32 %v1137_v30, %v968_v52  ;;  %v676_v33 = vpop.f32.mrb[15].mxu1 }
 0x1dd   : > { %v677_v34 = vadd.f32 %v968_v52, %v676_v33  ;;  %1188 = vmatprep.mubr.f32.mxu0 %v697_v29 }
 0x1de   : > { %1189 = vmatmul.mubr.f32.gmra.mrb[28].mxu0 %v698_v31  ;;  %v700_v36 = vmax.f32 %v682_v32, 0.0 }
 0x1df   : > { %v699_v35 = vmax.f32 %v677_v34, 0.0 }
 0x1e1   : > { %1191 = vmatprep.mubr.f32.mxu0 %v699_v35 }
 0x1e2   : > { %1192 = vmatmul.mubr.f32.gmra.mrb[30].mxu0 %v700_v36 }
 0x299   : > { %v1172_v38 = vpop.f32.mrb[16].mxu0 }
 0x29a   : > { %v796_v39 = vadd.f32 %v1172_v38, %v969_v37  ;;  %v790_v40 = vpop.f32.mrb[17].mxu0 }
 0x29b   : > { %v791_v41 = vadd.f32 %v969_v37, %v790_v40 }
 0x29c   : > { %871 = vst.msk [vmem:[%s1484_s26 + $0x8] sm:$0xff] %vm869_vm1, %v796_v39 }
 0x29d   : > { %870 = vst.msk [vmem:[%s1484_s26] sm:$0xff] %vm869_vm1, %v791_v41  ;;  %v1175_v42 = vpop.f32.mrb[18].mxu0 }
 0x29e   : > { %v806_v43 = vadd.f32 %v1175_v42, %v969_v37  ;;  %v800_v44 = vpop.f32.mrb[19].mxu0 }
 0x29f   : > { %v801_v45 = vadd.f32 %v969_v37, %v800_v44 }
 0x2a0   : > { %873 = vst.msk [vmem:[%s1484_s26 + $0x18] sm:$0xff] %vm869_vm1, %v806_v43 }
 0x2a1   : > { %872 = vst.msk [vmem:[%s1484_s26 + $0x10] sm:$0xff] %vm869_vm1, %v801_v45  ;;  %v1178_v46 = vpop.f32.mrb[20].mxu0 }
 0x2a2   : > { %v816_v47 = vadd.f32 %v1178_v46, %v969_v37  ;;  %v810_v48 = vpop.f32.mrb[21].mxu0 }
 0x2a3   : > { %v811_v49 = vadd.f32 %v969_v37, %v810_v48 }
 0x2a4   : > { %875 = vst.msk [vmem:[%s1484_s26 + $0x28] sm:$0xff] %vm869_vm1, %v816_v47 }
 0x2a5   : > { %874 = vst.msk [vmem:[%s1484_s26 + $0x20] sm:$0xff] %vm869_vm1, %v811_v49  ;;  %v1181_v50 = vpop.f32.mrb[22].mxu0 }
 0x2a6   : > { %v826_v51 = vadd.f32 %v1181_v50, %v969_v37  ;;  %v820_v52 = vpop.f32.mrb[23].mxu0 }
 0x2a7   : > { %v821_v53 = vadd.f32 %v969_v37, %v820_v52 }
 0x2a8   : > { %877 = vst.msk [vmem:[%s1484_s26 + $0x38] sm:$0xff] %vm869_vm1, %v826_v51 }
 0x2a9   : > { %876 = vst.msk [vmem:[%s1484_s26 + $0x30] sm:$0xff] %vm869_vm1, %v821_v53  ;;  %v1184_v54 = vpop.f32.mrb[24].mxu0 }
 0x2aa   : > { %v836_v55 = vadd.f32 %v1184_v54, %v969_v37  ;;  %v830_v56 = vpop.f32.mrb[25].mxu0 }
 0x2ab   : > { %v831_v57 = vadd.f32 %v969_v37, %v830_v56 }
 0x2ac   : > { %879 = vst.msk [vmem:[%s1484_s26 + $0x48] sm:$0xff] %vm869_vm1, %v836_v55 }
 0x2ad   : > { %878 = vst.msk [vmem:[%s1484_s26 + $0x40] sm:$0xff] %vm869_vm1, %v831_v57  ;;  %v1187_v58 = vpop.f32.mrb[26].mxu0 }
 0x2ae   : > { %v846_v59 = vadd.f32 %v1187_v58, %v969_v37  ;;  %v840_v60 = vpop.f32.mrb[27].mxu0 }
 0x2af   : > { %v841_v61 = vadd.f32 %v969_v37, %v840_v60 }
 0x2b0   : > { %881 = vst.msk [vmem:[%s1484_s26 + $0x58] sm:$0xff] %vm869_vm1, %v846_v59 }
 0x2b1   : > { %880 = vst.msk [vmem:[%s1484_s26 + $0x50] sm:$0xff] %vm869_vm1, %v841_v61  ;;  %v1190_v62 = vpop.f32.mrb[28].mxu0 }
 0x2b2   : > { %v856_v63 = vadd.f32 %v1190_v62, %v969_v37  ;;  %v850_v0 = vpop.f32.mrb[29].mxu0 }
 0x2b3   : > { %v851_v1 = vadd.f32 %v969_v37, %v850_v0 }
 0x2b4   : > { %883 = vst.msk [vmem:[%s1484_s26 + $0x68] sm:$0xff] %vm869_vm1, %v856_v63 }
 0x2b5   : > { %882 = vst.msk [vmem:[%s1484_s26 + $0x60] sm:$0xff] %vm869_vm1, %v851_v1  ;;  %v1193_v2 = vpop.f32.mrb[30].mxu0 }
 0x2b6   : > { %v866_v3 = vadd.f32 %v1193_v2, %v969_v37  ;;  %v860_v4 = vpop.f32.mrb[31].mxu0 }
 0x2b7   : > { %v861_v5 = vadd.f32 %v969_v37, %v860_v4 }
 0x2b8   : > { %885 = vst.msk [vmem:[%s1484_s26 + $0x78] sm:$0xff] %vm869_vm1, %v866_v3 }
 0x2b9   : > { %884 = vst.msk [vmem:[%s1484_s26 + $0x70] sm:$0xff] %vm869_vm1, %v861_v5 }
 0x2ba PF: > { %s17_s24 = sadd.s32 1, %s1276_s24  }
 0x2bb   : > { %p14_p4 = scmp.ge.s32.totalorder %s17_s24, 4  }
 0x2bd   :  { %16 = sbr.rel (!%p14_p4) target bundleno = 1 (0x1), region = 78 }

</bundles_post_ra>
